<compile_context>
chip_gen: v7x
topology: tpu7x:2x2x1
jax: 0.10.0
libtpu: 0.0.40
codegen_flags: <defaults>
</compile_context>

<pallas_src>
import math

import jax
import jax.numpy as jnp
from jax.experimental import pallas as pl
from jax.experimental.pallas import tpu as pltpu


def _round_up(x, m):
    return (x + m - 1) // m * m


def _pad_feature(d):
    # Lane-dense alignment: 128 minimum; larger dims rounded to 256 to fill
    # the 2x256x256 MXUs on v6e/v7x (128 already fills v5e's 4x128x128).
    if d <= 128:
        return 128
    return _round_up(d, 256)


def _pick_hidden_chunk(hid_p, max_chunk=512):
    # hid_p is a multiple of 128 (and of 256 when > 128), so this terminates.
    for c in (max_chunk, 256, 128):
        if c <= hid_p and hid_p % c == 0:
            return c
    return hid_p


def _vmem_cap_bytes():
    # ~96 MiB usable on v5e/v6e (128 MiB physical), ~48 MiB on v7x (64 MiB).
    try:
        cap = int(pltpu.get_tpu_info().vmem_capacity_bytes)
    except Exception:
        cap = 64 * 2**20  # conservative fallback (v7x per-core physical)
    return cap * 3 // 4


def _working_set_bytes(tb, in_p, th, out_p, out_itemsize):
    # Pallas double-buffers every input/output block by default (even with a
    # constant index_map), so count them 2x; the f32 accumulator is scratch.
    return (2 * tb * in_p * 2          # x tile (bf16)
            + 2 * in_p * th * 2        # w1 chunk (bf16)
            + 2 * th * 4               # b1 chunk (f32)
            + 2 * th * out_p * 2       # w2 chunk (bf16)
            + 2 * out_p * 4            # b2 (f32)
            + 2 * tb * out_p * out_itemsize   # out tile
            + tb * out_p * 4)          # f32 accumulator scratch


def mlp_kernel(x_ref, w1_ref, b1_ref, w2_ref, b2_ref, o_ref, acc_ref):
    """One (batch tile, hidden chunk) step of fc1 -> ReLU -> fc2."""
    k = pl.program_id(1)

    @pl.when(k == 0)
    def _():
        acc_ref[...] = jnp.zeros_like(acc_ref)

    # fc1 chunk: (TB, IN_P) @ (IN_P, TH) -> f32 accumulate on the MXU.
    h = jnp.dot(x_ref[...], w1_ref[...], preferred_element_type=jnp.float32)
    h = jnp.maximum(h + b1_ref[...], 0.0)          # bias + ReLU (VPU filler)

    # fc2 chunk: accumulate (TB, TH) @ (TH, OUT_P) into the f32 scratch.
    # h is downcast to bf16 so the second matmul also runs at native MXU rate.
    acc_ref[...] += jnp.dot(h.astype(w2_ref.dtype), w2_ref[...],
                            preferred_element_type=jnp.float32)

    @pl.when(k == pl.num_programs(1) - 1)
    def _():
        o_ref[...] = (acc_ref[...] + b2_ref[...]).astype(o_ref.dtype)


def prepare_mlp_params(w1, b1, w2, b2, compute_dtype=jnp.bfloat16):
    """One-time pad + cast of the weights/biases (hoisted out of forward).

    w1: (in, hid); b1: (hid,) or (1, hid); w2: (hid, out); b2: (out,) or (1, out).
    """
    in_size, hid = w1.shape
    out_size = w2.shape[1]
    in_p, hid_p, out_p = map(_pad_feature, (in_size, hid, out_size))

    w1_p = jnp.zeros((in_p, hid_p), compute_dtype).at[:in_size, :hid].set(
        w1.astype(compute_dtype))
    w2_p = jnp.zeros((hid_p, out_p), compute_dtype).at[:hid, :out_size].set(
        w2.astype(compute_dtype))
    b1_p = jnp.zeros((1, hid_p), jnp.float32).at[:, :hid].set(
        jnp.reshape(b1, (1, hid)).astype(jnp.float32))
    b2_p = jnp.zeros((1, out_p), jnp.float32).at[:, :out_size].set(
        jnp.reshape(b2, (1, out_size)).astype(jnp.float32))

    return dict(w1=w1_p, b1=b1_p, w2=w2_p, b2=b2_p,
                in_size=in_size, hid=hid, out_size=out_size,
                compute_dtype=compute_dtype)


def mlp_forward(x, params, *, block_b=256, hidden_chunk=512):
    """x: (B, in_size). Returns (B, out_size) in x.dtype.

    block_b is worth sweeping (128/256/512): larger tiles amortize per-step
    overhead; the per-generation VMEM cap is what ultimately bounds it.
    """
    B, in_size = x.shape
    assert in_size == params["in_size"]
    out_size = params["out_size"]
    out_dtype = x.dtype
    out_itemsize = jnp.dtype(out_dtype).itemsize
    cd = params["compute_dtype"]

    w1_p, b1_p, w2_p, b2_p = (params["w1"], params["b1"],
                              params["w2"], params["b2"])
    in_p, hid_p = w1_p.shape
    out_p = w2_p.shape[1]
    th = _pick_hidden_chunk(hid_p, hidden_chunk)
    n_h = hid_p // th

    # Batch tile: multiple of 8 sublanes, capped at block_b.
    tb = max(8, _round_up(min(block_b, B), 8))

    # Shrink TB if the (double-buffered) working set would overflow VMEM.
    vmem_cap = _vmem_cap_bytes()
    while tb > 64 and 2 * _working_set_bytes(tb, in_p, th, out_p,
                                             out_itemsize) > vmem_cap:
        tb = max(64, _round_up(tb // 2, 8))

    # Keep the batch-tile count even (v7x has 2 TensorCores per chip and the
    # batch axis is "parallel"); do it by shrinking TB, not by padding B.
    n_b = pl.cdiv(B, tb)
    if n_b > 1 and n_b % 2 == 1:
        n_b += 1
        tb = _round_up(-(-B // n_b), 8)
    b_pad = n_b * tb

    # Pad + cast only x per call (zero rows/cols are inert through both
    # matmuls and ReLU, and are sliced off below).
    x_p = jnp.zeros((b_pad, in_p), cd).at[:B, :in_size].set(x.astype(cd))

    ws = _working_set_bytes(tb, in_p, th, out_p, out_itemsize)
    vmem_limit = int(min(max(2 * ws, 32 * 2**20), vmem_cap))

    weight_bytes = (in_p * hid_p + hid_p * out_p) * 2 + (hid_p + out_p) * 4
    cost = pl.CostEstimate(
        flops=2 * b_pad * (in_p * hid_p + hid_p * out_p),
        transcendentals=0,
        bytes_accessed=(b_pad * in_p * 2 + b_pad * out_p * out_itemsize
                        + weight_bytes * (n_b if n_h > 1 else 1)),
    )

    out_padded = pl.pallas_call(
        mlp_kernel,
        out_shape=jax.ShapeDtypeStruct((b_pad, out_p), out_dtype),
        grid=(n_b, n_h),
        in_specs=[
            pl.BlockSpec((tb, in_p), lambda i, k: (i, 0)),    # x tile
            pl.BlockSpec((in_p, th), lambda i, k: (0, k)),    # w1 chunk
            pl.BlockSpec((1, th), lambda i, k: (0, k)),       # b1 chunk
            pl.BlockSpec((th, out_p), lambda i, k: (k, 0)),   # w2 chunk
            pl.BlockSpec((1, out_p), lambda i, k: (0, 0)),    # b2
        ],
        out_specs=pl.BlockSpec((tb, out_p), lambda i, k: (i, 0)),
        scratch_shapes=[pltpu.VMEM((tb, out_p), jnp.float32)],  # f32 acc
        compiler_params=pltpu.CompilerParams(
            dimension_semantics=("parallel", "arbitrary"),
            vmem_limit_bytes=vmem_limit,
        ),
        cost_estimate=cost,
    )(x_p, w1_p, b1_p, w2_p, b2_p)

    # TODO(synk): on v7x, single-buffering the k-invariant blocks via
    # pipeline_mode=pl.Buffered(1) would recover ~half the weight VMEM.
    return out_padded[:B, :out_size]


def init_linear_params(key, fan_in, fan_out, dtype=jnp.float32):
    """PyTorch nn.Linear init: U(-1/sqrt(fan_in), 1/sqrt(fan_in))."""
    k_w, k_b = jax.random.split(key)
    bound = 1.0 / math.sqrt(fan_in)
    # stored as (fan_in, fan_out) = transpose of PyTorch's (out, in) layout
    w = jax.random.uniform(k_w, (fan_in, fan_out), dtype, -bound, bound)
    b = jax.random.uniform(k_b, (1, fan_out), dtype, -bound, bound)
    return w, b


if __name__ == "__main__":
    batch = 256          # small, but gives a 2-step (even) batch grid
    input_size = 32
    hidden_size = 64
    output_size = 16

    key = jax.random.PRNGKey(0)
    k_x, k_fc1, k_fc2 = jax.random.split(key, 3)

    x = jax.random.normal(k_x, (batch, input_size), jnp.float32)
    w1, b1 = init_linear_params(k_fc1, input_size, hidden_size)
    w2, b2 = init_linear_params(k_fc2, hidden_size, output_size)

    params = prepare_mlp_params(w1, b1, w2, b2)           # one-time pad+cast
    out = mlp_forward(x, params, block_b=128)             # grid = (2, 1)
    out = jax.block_until_ready(out)
    assert out.shape == (batch, output_size)

    # Reference with the same bf16-operand / f32-accumulate precision policy.
    cd = jnp.bfloat16
    h_ref = jnp.maximum(
        jnp.dot(x.astype(cd), w1.astype(cd),
                preferred_element_type=jnp.float32) + b1, 0.0)
    ref = jnp.dot(h_ref.astype(cd), w2.astype(cd),
                  preferred_element_type=jnp.float32) + b2
    assert jnp.allclose(out.astype(jnp.float32), ref, atol=5e-3, rtol=5e-3)

    # Sanity vs the pure-f32 math (loose: bf16 operand rounding only).
    ref_f32 = jnp.maximum(x @ w1 + b1, 0.0) @ w2 + b2
    assert jnp.allclose(out.astype(jnp.float32), ref_f32, atol=0.2, rtol=0.1)

    print("KERNEL_OK")
</pallas_src>

<mosaic_0001>
module attributes {stable_mosaic.version = 11 : i64} {
  func.func @mlp_kernel(%arg0: i32, %arg1: i32, %arg2: memref<128x128xbf16, #tpu.memory_space<vmem>>, %arg3: memref<128x128xbf16, #tpu.memory_space<vmem>>, %arg4: memref<1x128xf32, #tpu.memory_space<vmem>>, %arg5: memref<128x128xbf16, #tpu.memory_space<vmem>>, %arg6: memref<1x128xf32, #tpu.memory_space<vmem>>, %arg7: memref<128x128xf32, #tpu.memory_space<vmem>>, %arg8: memref<128x128xf32, #tpu.memory_space<vmem>>) attributes {dimension_semantics = [#tpu.dimension_semantics<parallel>, #tpu.dimension_semantics<arbitrary>], iteration_bounds = array<i64: 2, 1>, scalar_prefetch = 0 : i64, scratch_operands = 1 : i64, tpu.core_type = #tpu.core_type<tc>, window_params = [{transform_indices = @transform_0, window_bounds = array<i64: 128, 128>}, {transform_indices = @transform_1, window_bounds = array<i64: 128, 128>}, {transform_indices = @transform_2, window_bounds = array<i64: 1, 128>}, {transform_indices = @transform_3, window_bounds = array<i64: 128, 128>}, {pipeline_mode = #tpu.pipeline_mode<synchronous>, transform_indices = @transform_4, window_bounds = array<i64: 1, 128>}, {transform_indices = @transform_5, window_bounds = array<i64: 128, 128>}]} {
    %c0_i32 = arith.constant 0 : i32
    %0 = arith.cmpi eq, %arg1, %c0_i32 : i32
    %1 = arith.extui %0 : i1 to i32
    %c0_i32_0 = arith.constant 0 : i32
    %2 = arith.cmpi ne, %1, %c0_i32_0 : i32
    scf.if %2 {
      %cst_16 = arith.constant 0.000000e+00 : f32
      %20 = vector.broadcast %cst_16 : f32 to vector<128x128xf32>
      %c0_17 = arith.constant 0 : index
      %c0_18 = arith.constant 0 : index
      %21 = vector.load %arg8[%c0_17, %c0_18] : memref<128x128xf32, #tpu.memory_space<vmem>>, vector<128x128xf32>
      tpu.vector_store %arg8[%c0_17, %c0_18], %20 {strides = array<i32>} : memref<128x128xf32, #tpu.memory_space<vmem>>, vector<128x128xf32>,
    } else {
    }
    %c0 = arith.constant 0 : index
    %c0_1 = arith.constant 0 : index
    %3 = vector.load %arg2[%c0, %c0_1] : memref<128x128xbf16, #tpu.memory_space<vmem>>, vector<128x128xbf16>
    %c0_2 = arith.constant 0 : index
    %c0_3 = arith.constant 0 : index
    %4 = vector.load %arg3[%c0_2, %c0_3] : memref<128x128xbf16, #tpu.memory_space<vmem>>, vector<128x128xbf16>
    %cst = arith.constant dense<0.000000e+00> : vector<128x128xf32>
    %5 = tpu.matmul %3, %4, %cst {dimension_numbers = #tpu.dot_dimension_numbers<[1], [0], [0], [1], [0, 0, 1, 1], [], []>} : vector<128x128xbf16>, vector<128x128xbf16>, vector<128x128xf32> -> vector<128x128xf32>
    %c0_4 = arith.constant 0 : index
    %c0_5 = arith.constant 0 : index
    %6 = vector.load %arg4[%c0_4, %c0_5] : memref<1x128xf32, #tpu.memory_space<vmem>>, vector<1x128xf32>
    %7 = vector.broadcast %6 : vector<1x128xf32> to vector<128x128xf32>
    %8 = arith.addf %5, %7 : vector<128x128xf32>
    %cst_6 = arith.constant 0.000000e+00 : f32
    %9 = vector.broadcast %cst_6 : f32 to vector<128x128xf32>
    %10 = arith.maximumf %8, %9 : vector<128x128xf32>
    %c0_7 = arith.constant 0 : index
    %c0_8 = arith.constant 0 : index
    %11 = vector.load %arg8[%c0_7, %c0_8] : memref<128x128xf32, #tpu.memory_space<vmem>>, vector<128x128xf32>
    %12 = arith.truncf %10 : vector<128x128xf32> to vector<128x128xbf16>
    %c0_9 = arith.constant 0 : index
    %c0_10 = arith.constant 0 : index
    %13 = vector.load %arg5[%c0_9, %c0_10] : memref<128x128xbf16, #tpu.memory_space<vmem>>, vector<128x128xbf16>
    %cst_11 = arith.constant dense<0.000000e+00> : vector<128x128xf32>
    %14 = tpu.matmul %12, %13, %cst_11 {dimension_numbers = #tpu.dot_dimension_numbers<[1], [0], [0], [1], [0, 0, 1, 1], [], []>} : vector<128x128xbf16>, vector<128x128xbf16>, vector<128x128xf32> -> vector<128x128xf32>
    %15 = arith.addf %11, %14 : vector<128x128xf32>
    %c0_12 = arith.constant 0 : index
    %c0_13 = arith.constant 0 : index
    %16 = vector.load %arg8[%c0_12, %c0_13] : memref<128x128xf32, #tpu.memory_space<vmem>>, vector<128x128xf32>
    tpu.vector_store %arg8[%c0_12, %c0_13], %15 {strides = array<i32>} : memref<128x128xf32, #tpu.memory_space<vmem>>, vector<128x128xf32>,
    %c0_i32_14 = arith.constant 0 : i32
    %17 = arith.cmpi eq, %arg1, %c0_i32_14 : i32
    %18 = arith.extui %17 : i1 to i32
    %c0_i32_15 = arith.constant 0 : i32
    %19 = arith.cmpi ne, %18, %c0_i32_15 : i32
    scf.if %19 {
      %c0_16 = arith.constant 0 : index
      %c0_17 = arith.constant 0 : index
      %20 = vector.load %arg8[%c0_16, %c0_17] : memref<128x128xf32, #tpu.memory_space<vmem>>, vector<128x128xf32>
      %c0_18 = arith.constant 0 : index
      %c0_19 = arith.constant 0 : index
      %21 = vector.load %arg6[%c0_18, %c0_19] : memref<1x128xf32, #tpu.memory_space<vmem>>, vector<1x128xf32>
      %22 = vector.broadcast %21 : vector<1x128xf32> to vector<128x128xf32>
      %23 = arith.addf %20, %22 : vector<128x128xf32>
      %c0_20 = arith.constant 0 : index
      %c0_21 = arith.constant 0 : index
      %24 = vector.load %arg7[%c0_20, %c0_21] : memref<128x128xf32, #tpu.memory_space<vmem>>, vector<128x128xf32>
      tpu.vector_store %arg7[%c0_20, %c0_21], %23 {strides = array<i32>} : memref<128x128xf32, #tpu.memory_space<vmem>>, vector<128x128xf32>,
    } else {
    }
    return
  }
  func.func @transform_0(%arg0: i32, %arg1: i32) -> (i32, i32) {
    %c0_i32 = arith.constant 0 : i32
    %c0_i32_0 = arith.constant 0 : i32
    return %arg0, %c0_i32 : i32, i32
  }
  func.func @transform_1(%arg0: i32, %arg1: i32) -> (i32, i32) {
    %c0_i32 = arith.constant 0 : i32
    %c0_i32_0 = arith.constant 0 : i32
    return %c0_i32, %arg1 : i32, i32
  }
  func.func @transform_2(%arg0: i32, %arg1: i32) -> (i32, i32) {
    %c0_i32 = arith.constant 0 : i32
    %c0_i32_0 = arith.constant 0 : i32
    return %c0_i32, %arg1 : i32, i32
  }
  func.func @transform_3(%arg0: i32, %arg1: i32) -> (i32, i32) {
    %c0_i32 = arith.constant 0 : i32
    %c0_i32_0 = arith.constant 0 : i32
    return %arg1, %c0_i32 : i32, i32
  }
  func.func @transform_4(%arg0: i32, %arg1: i32) -> (i32, i32) {
    %c0_i32 = arith.constant 0 : i32
    %c0_i32_0 = arith.constant 0 : i32
    %c0_i32_1 = arith.constant 0 : i32
    return %c0_i32, %c0_i32_0 : i32, i32
  }
  func.func @transform_5(%arg0: i32, %arg1: i32) -> (i32, i32) {
    %c0_i32 = arith.constant 0 : i32
    %c0_i32_0 = arith.constant 0 : i32
    return %arg0, %c0_i32 : i32, i32
  }
}

</mosaic_0001>

<bundles_post_ra>
// kernel: tpu_custom_call.1
= control target key start
LH: loop header
LB: loop body
LE: loop exit
PB: predicated region body
PF: predicated region fallthrough
CT: control target
= control target key end

     0   :  { %10 = vsyncpa [#allocation4], 0  ;;  %s1757_s0 = inlined_call_operand.hbm [shape: bf16[256,128], index: 0, kind: input, shape index: {}]   ;;  %s1758_s1 = inlined_call_operand.hbm [shape: bf16[128,128], index: 1, kind: input, shape index: {}]   ;;  %s1759_s2 = inlined_call_operand.vmem [shape: f32[1,128], index: 2, kind: input, shape index: {}]   ;;  %s1760_s3 = inlined_call_operand.hbm [shape: bf16[128,128], index: 3, kind: input, shape index: {}]   ;;  %s1761_s4 = inlined_call_operand.vmem [shape: f32[1,128], index: 4, kind: input, shape index: {}]   ;;  %s1762_s5 = inlined_call_operand.hbm [shape: f32[256,128], index: 5, kind: output, shape index: {}]  }
   0x1   :  { %12 = vsyncpa [#allocation4 + $0x1], 0 }
   0x2   :  { %13 = vsyncpa [#allocation7], 0 }
   0x3   :  { %14 = vsyncpa [#allocation5], 0 }
   0x4   :  { %16 = vsyncpa [#allocation5 + $0x1], 0  ;;  %s1457_s18 = smov 0   ;;  %s1459_s19 = smov 0  }
   0x5   :  { %s1461_s20 = smov 0   ;;  %s1463_s21 = smov 0  }
   0x6   :  { %s1465_s22 = smov 0   ;;  %s1467_s23 = smov 0  }
   0x7 LB: > { %s990_s24 = sadd.s32 4294967295, %s1417_s23   ;;  %s991_s25 = sadd.s32 4294967294, %s1417_s23   ;;  %s1417_s23 = sphi %s1467_s23, %s22_s23   ;;  %s1413_s22 = sphi %s1465_s22, %s1786_s22   ;;  %s1409_s21 = sphi %s1463_s21, %s1785_s21   ;;  %s1405_s20 = sphi %s1461_s20, %s1784_s20   ;;  %s1401_s19 = sphi %s1459_s19, %s1783_s19   ;;  %s1397_s18 = sphi %s1457_s18, %s1782_s18  }
   0x8   : > { %p54_p0 = scmp.ne.s32.totalorder %s1401_s19, %s1397_s18  ;;  %p1491_p1 = scmp.eq.s32.totalorder %s990_s24, 0 }
   0x9   : > { %p1495_p2 = scmp.eq.s32.totalorder %s990_s24, 1  ;;  %p183_p3 = scmp.eq.s32.totalorder %s991_s25, 1 }
   0xa   : > { %s1768_s26 = scalar_select %p1491_p1, 1, 0 }
   0xb   : > { %p1501_p4 = por %p1491_p1, %p54_p0  ;;  %p992_p5 = scmp.ge.s32.totalorder %s1417_s23, 1 }
   0xc   : > { %p1506_p6 = por %p183_p3, %p54_p0  ;;  %p190_p7 = scmp.lt.s32.totalorder %s1417_s23, 3 }
   0xd   : > { %s1770_s28 = scalar_select %p1501_p4, 1, 0 }
   0xe   : > { %s1771_s29 = scalar_select %p1506_p6, 1, 0 }
   0xf   : > { %p1511_p8 = pnand %p992_p5, %p190_p7  ;;  %s1419_s6 = smov [#allocation6]  }
  0x10   : > { %s204_s7 = sshll.u32 %s1419_s6, 4  ;;  %s1420_s9 = smov [#allocation8]   ;;  %s1515_s7 = int_to_ptr.vmem [resolvable:$true] %s204_s7 }
  0x11   : > { %p1146_p9 = pneg %p1511_p8  ;;  %s226_s10 = sshll.u32 %s1420_s9, 4  ;;  %s1526_s10 = int_to_ptr.vmem [resolvable:$true] %s226_s10 }
  0x12   : > { %s1245_s13 = scalar_lea.hbm %s1758_s1, 1024 }
  0x13   : > { %p1522_p11 = pnand %p1146_p9, %p1491_p1  ;;  %p1246_p12 = scmp.ne.s32.totalorder %s1758_s1, %s1245_s13 }
  0x14   : > { %p1252_p5 = scmp.lt.u32.totalorder %s1245_s13, %s1758_s1 }
  0x15   : > { %p1247_p13 = pneg %p1522_p11 }
  0x17   : > { %p1248_p0 = pnand %p1247_p13, %p1246_p12 }
  0x19   : > { %p1249_p3 = pneg %p1248_p0 }
  0x1b   : > { %p1254_p7 = pnand %p1252_p5, %p1249_p3 }
  0x1d   : > { %1257 = shalt.err (!%p1254_p7)
}
  0x1e   : > { %s1258_s24 = scalar_lea.vmem %s1515_s7, 1024  ;;  %p1266_p1 = scmp.lt.s32.totalorder %s1515_s7, %s1515_s7 }
  0x1f   : > { %p1259_p9 = scmp.ne.s32.totalorder %s1515_s7, %s1258_s24  ;;  %p1267_p12 = scmp.lt.s32.totalorder %s1258_s24, %s1258_s24 }
  0x21   : > { %p1261_p10 = pnand %p1259_p9, %p1247_p13  ;;  %p1268_p0 = por %p1267_p12, %p1266_p1 }
  0x23   : > { %p1262_p6 = pneg %p1261_p10 }
  0x25   : > { %p1269_p4 = pnand %p1268_p0, %p1262_p6 }
  0x27   : > { %1272 = shalt.err (!%p1269_p4)
}
  0x28   : > { %s1766_s25 = smov 64   ;;  %s1422_s6 = smov 4  }
  0x29   : > { %1149 = dma.hbm_to_vmem [thread:$0]  (!%p1522_p11), %s1758_s1, 1024, %s1515_s7, [#allocation7], %s1766_s25, %s1766_s25, %s1422_s6  }
  0x2a   : > { %s1273_s14 = scalar_lea.hbm %s1760_s3, 1024 }
  0x2b   : > { %p1274_p1 = scmp.ne.s32.totalorder %s1760_s3, %s1273_s14  ;;  %p1280_p10 = scmp.lt.u32.totalorder %s1273_s14, %s1760_s3 }
  0x2d   : > { %p1276_p4 = pnand %p1274_p1, %p1247_p13 }
  0x2f   : > { %p1277_p6 = pneg %p1276_p4 }
  0x31   : > { %p1282_p3 = pnand %p1280_p10, %p1277_p6 }
  0x33   : > { %1285 = shalt.err (!%p1282_p3)
}
  0x34   : > { %s1286_s7 = scalar_lea.vmem %s1526_s10, 1024  ;;  %p1294_p12 = scmp.lt.s32.totalorder %s1526_s10, %s1526_s10 }
  0x35   : > { %p1287_p5 = scmp.ne.s32.totalorder %s1526_s10, %s1286_s7  ;;  %p1295_p0 = scmp.lt.s32.totalorder %s1286_s7, %s1286_s7 }
  0x37   : > { %p1289_p7 = pnand %p1287_p5, %p1247_p13  ;;  %p1296_p1 = por %p1295_p0, %p1294_p12 }
  0x39   : > { %p1290_p9 = pneg %p1289_p7 }
  0x3b   : > { %p1297_p4 = pnand %p1296_p1, %p1290_p9 }
  0x3d   : > { %1300 = shalt.err (!%p1297_p4)
}
  0x3e   : > { %1152 = dma.hbm_to_vmem [thread:$0]  (!%p1522_p11), %s1760_s3, 1024, %s1526_s10, [#allocation7], %s1766_s25, %s1766_s25, %s1422_s6  }
  0x3f   : > { %s34_s8 = sadd.s32 1, %s1413_s22  ;;  %s41_s12 = sadd.s32 1, %s1405_s20 }
  0x40   : > { %p36_p13 = scmp.ge.s32.totalorder %s34_s8, 2  ;;  %p48_p6 = scmp.ne.s32.totalorder %s1405_s20, %s1401_s19 }
  0x41   : > { %p49_p10 = scmp.eq.s32.totalorder %s1417_s23, 0  ;;  %p1163_p3 = scmp.lt.s32.totalorder %s1417_s23, 2 }
  0x42   : > { %s1788_s8 = smov (%p36_p13, %s34_s8), 0  ;;  %p1596_p7 = por %p1495_p2, %p48_p6 }
  0x43   : > { %p50_p5 = por %p49_p10, %p48_p6  ;;  %s38_s14 = ssub.s32 %s1413_s22, %s1788_s8 }
  0x44   : > { %s1774_s13 = scalar_select %p1596_p7, 1, 0 }
  0x45   : > { %s243_s15 = sand.u32 1, %s1405_s20   ;;  %p39_p9 = scmp.eq.s32.totalorder %s38_s14, 0 }
  0x46   : > { %s997_s10 = sshll.u32 %s243_s15, 6  ;;  %s1036_s16 = sshll.u32 %s1413_s22, 10 }
  0x47   : > { %s1605_s17 = scalar_select %p39_p9, %s1405_s20, %s41_s12  }
  0x48   : > { %s1610_s9 = scalar_lea.hbm %s1757_s0, %s1036_s16  ;;  %s247_s27 = scalar_lea.vmem [#allocation3], %s997_s10 }
  0x49   : > { %s254_s11 = sshll.u32 %s247_s27, 4  ;;  %p1614_p2 = pnand %p1163_p3, %p50_p5  ;;  %s1618_s11 = int_to_ptr.vmem [resolvable:$true] %s254_s11 }
  0x4a   : > { %s1620_s12 = scalar_lea.sflag [#allocation4], %s243_s15  ;;  %s1301_s14 = scalar_lea.hbm %s1610_s9, 1024 }
  0x4b   : > { %p1302_p11 = scmp.ne.s32.totalorder %s1610_s9, %s1301_s14  ;;  %p1303_p12 = pneg %p1614_p2 }
  0x4c   : > { %s1306_s24 = scalar_lea.hbm %s1757_s0, 2048  ;;  %p1307_p4 = scmp.lt.u32.totalorder %s1610_s9, %s1757_s0 }
  0x4d   : > { %p1304_p0 = pnand %p1303_p12, %p1302_p11  ;;  %p1308_p13 = scmp.lt.u32.totalorder %s1306_s24, %s1301_s14 }
  0x4e   : > { %p1310_p10 = scmp.lt.u32.totalorder %s1301_s14, %s1610_s9 }
  0x4f   : > { %p1305_p1 = pneg %p1304_p0  ;;  %p1309_p6 = por %p1308_p13, %p1307_p4 }
  0x51   : > { %p1311_p3 = por %p1310_p10, %p1309_p6 }
  0x53   : > { %p1312_p5 = pnand %p1311_p3, %p1305_p1 }
  0x55   : > { %1315 = shalt.err (!%p1312_p5)
}
  0x56   : > { %s1316_s15 = scalar_lea.vmem %s1618_s11, 1024  ;;  %s1423_s10 = smov [#allocation3]  }
  0x57   : > { %p1317_p9 = scmp.ne.s32.totalorder %s1618_s11, %s1316_s15  ;;  %s1321_s16 = sshll.u32 %s1423_s10, 4  ;;  %s1322_s16 = int_to_ptr.vmem [resolvable:$false] %s1321_s16 }
  0x58   : > { %s1323_s7 = scalar_lea.vmem %s1322_s16, 2048  ;;  %p1324_p7 = scmp.lt.s32.totalorder %s1618_s11, %s1322_s16 }
  0x59   : > { %p1319_p11 = pnand %p1317_p9, %p1303_p12  ;;  %p1325_p4 = scmp.lt.s32.totalorder %s1323_s7, %s1316_s15 }
  0x5b   : > { %p1320_p0 = pneg %p1319_p11  ;;  %p1326_p13 = por %p1325_p4, %p1324_p7 }
  0x5d   : > { %p1327_p6 = pnand %p1326_p13, %p1320_p0 }
  0x5f   : > { %1330 = shalt.err (!%p1327_p6)
}
  0x60   : > { %s1776_s14 = smov 64   ;;  %266 = sbr.rel (%p1511_p8) target bundleno = 618 (0x26a), region = 40 }
  0x61   : > { %1156 = dma.hbm_to_vmem [thread:$0]  (!%p1614_p2), %s1610_s9, 1024, %s1618_s11, %s1620_s12, %s1776_s14, %s1776_s14, %s1422_s6  }
  0x62   : > { %s1654_s24 = sand.u32 (!%p1511_p8), 1, %s1401_s19   ;;  %p1777_p7 = scmp.ne.s32.totalorder (!%p1511_p8), %s1770_s28, 0 }
  0x63   : > { %s1001_s27 = sshll.u32 (!%p1511_p8), %s1654_s24, 6  ;;  %s269_s15 = scalar_lea.sflag (!%p1511_p8), [#allocation4], %s1654_s24 }
  0x64   : > { %s1658_s10 = scalar_lea.vmem (!%p1511_p8), [#allocation3], %s1001_s27 }
  0x67   : > { %1384 = dma.done.wait (%p1777_p7), %s269_s15, 1024  }
  0x68   : > { %1386 = vsyncadd (%p1777_p7), %s269_s15, 4294966272  ;;  %p1778_p2 = scmp.ne.s32.totalorder %s1768_s26, 0 }
  0x6a   : > { %1388 = dma.done.wait (%p1778_p2), [#allocation7], 2048  }
  0x6b   : > { %1390 = vsyncadd (%p1778_p2), [#allocation7], 4294965248  ;;  %v1221_v0 = vld [vmem:[#allocation6] sm:$0xff]   ;;  %v1222_v1 = vld [vmem:[#allocation6 + $0x8] sm:$0xff]   ;;  %s1004_s30 = sshll.u32 %s1654_s24, 7  ;;  %s1037_s11 = sshll.u32 %s1409_s21, 11 }
  0x6c   : > { %1070 = vmatprep.subr.bf16.mxu0 %v1221_v0  ;;  %v1223_v2 = vld [vmem:[#allocation6 + $0x10] sm:$0xff]   ;;  %v1224_v3 = vld [vmem:[#allocation6 + $0x18] sm:$0xff]   ;;  %v1229_v4 = vld [vmem:[%s1658_s10] sm:$0xff]   ;;  %s1683_s9 = scalar_lea.vmem [#allocation9], %s1004_s30  ;;  %s1703_s14 = scalar_lea.hbm %s1762_s5, %s1037_s11 }
  0x6d   : > { %1071 = vmatpush3.bf16.msra.mxu0 %v1221_v0  ;;  %1086 = vmatprep.mubr.bf16.mxu0 %v1229_v4  ;;  %v1225_v5 = vld [vmem:[#allocation6 + $0x20] sm:$0xff]   ;;  %v1226_v6 = vld [vmem:[#allocation6 + $0x28] sm:$0xff]   ;;  %v1227_v9 = vld [vmem:[#allocation6 + $0x30] sm:$0xff]   ;;  %s874_s12 = sshll.u32 %s1683_s9, 4  ;;  %s861_s21 = scalar_lea.sflag [#allocation5], %s1654_s24  ;;  %s1705_s12 = int_to_ptr.vmem [resolvable:$true] %s874_s12 }
  0x6e   : > { %1072 = vmatprep.subr.bf16.mxu0 %v1222_v1  ;;  %v1237_v7 = vld [vmem:[#allocation8] sm:$0xff]   ;;  %v1238_v8 = vld [vmem:[#allocation8 + $0x8] sm:$0xff]   ;;  %v1239_v10 = vld [vmem:[#allocation8 + $0x10] sm:$0xff]   ;;  %s1331_s27 = scalar_lea.vmem %s1705_s12, 2048  ;;  %p1779_p12 = scmp.ne.s32.totalorder %s1774_s13, 0 }
  0x6f   : > { %1102 = vmatprep.subr.bf16.mxu1 %v1237_v7  ;;  %v1228_v11 = vld [vmem:[#allocation6 + $0x38] sm:$0xff]   ;;  %v1241_v13 = vld [vmem:[#allocation8 + $0x20] sm:$0xff]   ;;  %v1230_v14 = vld [vmem:[%s1658_s10 + $0x8] sm:$0xff]   ;;  %p1332_p8 = scmp.ne.s32.totalorder %s1705_s12, %s1331_s27  ;;  %s1424_s15 = smov [#allocation9]  }
  0x70   : > { %1103 = vmatpush3.bf16.msra.mxu1 %v1237_v7  ;;  %v1240_v12 = vld [vmem:[#allocation8 + $0x18] sm:$0xff]   ;;  %v1231_v15 = vld [vmem:[%s1658_s10 + $0x10] sm:$0xff]   ;;  %v1242_v16 = vld [vmem:[#allocation8 + $0x28] sm:$0xff]  }
  0x71   : > { %1073 = vmatpush3.bf16.msra.mxu0 %v1222_v1  ;;  %1104 = vmatprep.subr.bf16.mxu1 %v1238_v8  ;;  %v1232_v17 = vld [vmem:[%s1658_s10 + $0x18] sm:$0xff]   ;;  %v1233_v18 = vld [vmem:[%s1658_s10 + $0x20] sm:$0xff]   ;;  %v1234_v19 = vld [vmem:[%s1658_s10 + $0x28] sm:$0xff]   ;;  %p1333_p1 = pnand %p1332_p8, %p1779_p12 }
  0x72   : > { %1074 = vmatprep.subr.bf16.mxu0 %v1223_v2  ;;  %v1235_v20 = vld [vmem:[%s1658_s10 + $0x30] sm:$0xff]   ;;  %v1236_v21 = vld [vmem:[%s1658_s10 + $0x38] sm:$0xff]   ;;  %v1005_v24 = vld [vmem:[%s1759_s2] ss:$0 sm:$0xff]  ;;  %s1335_s10 = sshll.u32 %s1424_s15, 4  ;;  %s1336_s10 = int_to_ptr.vmem [resolvable:$false] %s1335_s10 }
  0x73   : > { %v1243_v22 = vld [vmem:[#allocation8 + $0x30] sm:$0xff]   ;;  %v1244_v23 = vld [vmem:[#allocation8 + $0x38] sm:$0xff]   ;;  %p1334_p10 = pneg %p1333_p1  ;;  %s1337_s26 = scalar_lea.vmem %s1336_s10, 4096 }
  0x74   : > { %1105 = vmatpush3.bf16.msra.mxu1 %v1238_v8  ;;  %p1338_p3 = scmp.lt.s32.totalorder %s1705_s12, %s1336_s10  ;;  %p1339_p5 = scmp.lt.s32.totalorder %s1337_s26, %s1331_s27 }
  0x75   : > { %1075 = vmatpush3.bf16.msra.mxu0 %v1223_v2  ;;  %1106 = vmatprep.subr.bf16.mxu1 %v1239_v10 }
  0x76   : > { %1076 = vmatprep.subr.bf16.mxu0 %v1224_v3  ;;  %p1340_p9 = por %p1339_p5, %p1338_p3 }
  0x78   : > { %1107 = vmatpush3.bf16.msra.mxu1 %v1239_v10  ;;  %p1341_p11 = pnand %p1340_p9, %p1334_p10 }
  0x79   : > { %1077 = vmatpush3.bf16.msra.mxu0 %v1224_v3  ;;  %1108 = vmatprep.subr.bf16.mxu1 %v1240_v12 }
  0x7a   : > { %1078 = vmatprep.subr.bf16.mxu0 %v1225_v5 }
  0x7c   : > { %1109 = vmatpush3.bf16.msra.mxu1 %v1240_v12 }
  0x7d   : > { %1079 = vmatpush3.bf16.msra.mxu0 %v1225_v5  ;;  %1110 = vmatprep.subr.bf16.mxu1 %v1241_v13 }
  0x7e   : > { %1080 = vmatprep.subr.bf16.mxu0 %v1226_v6 }
  0x80   : > { %1111 = vmatpush3.bf16.msra.mxu1 %v1241_v13 }
  0x81   : > { %1081 = vmatpush3.bf16.msra.mxu0 %v1226_v6  ;;  %1112 = vmatprep.subr.bf16.mxu1 %v1242_v16 }
  0x82   : > { %1082 = vmatprep.subr.bf16.mxu0 %v1227_v9 }
  0x84   : > { %1113 = vmatpush3.bf16.msra.mxu1 %v1242_v16 }
  0x85   : > { %1083 = vmatpush3.bf16.msra.mxu0 %v1227_v9  ;;  %1114 = vmatprep.subr.bf16.mxu1 %v1243_v22 }
  0x86   : > { %1084 = vmatprep.subr.bf16.mxu0 %v1228_v11 }
  0x88   : > { %1115 = vmatpush3.bf16.msra.mxu1 %v1243_v22 }
  0x89   : > { %1085 = vmatpush3.bf16.msra.mxu0 %v1228_v11  ;;  %1116 = vmatprep.subr.bf16.mxu1 %v1244_v23 }
  0x8c   : > { %1087 = vmatmul.mubr.bf16.vlgmr.msra.gmra.mrb[0].mxu0 %v1230_v14  ;;  %1117 = vmatpush3.bf16.msra.mxu1 %v1244_v23 }
  0x8d   : > { %1090 = vmatprep.mubr.bf16.mxu0 %v1231_v15 }
  0x94   : > { %1091 = vmatmul.mubr.bf16.gmra.mrb[4].mxu0 %v1232_v17  ;;  %v1030_v17 = vld [vmem:[%s1761_s4] ss:$0 sm:$0xff] }
  0x95   : > { %1094 = vmatprep.mubr.bf16.mxu0 %v1233_v18 }
  0x9c   : > { %1095 = vmatmul.mubr.bf16.gmra.mrb[8].mxu0 %v1234_v19 }
  0x9d   : > { %1098 = vmatprep.mubr.bf16.mxu0 %v1235_v20 }
  0xa4   : > { %1099 = vmatmul.mubr.bf16.gmra.mrb[12].mxu0 %v1236_v21 }
 0x15f   : > { %v1088_v25 = vpop.f32.mrb[0].mxu0 }
 0x160   : > { %v515_v26 = vadd.f32 %v1088_v25, %v1005_v24  ;;  %v506_v27 = vpop.f32.mrb[1].mxu0 }
 0x161   : > { %v507_v28 = vadd.f32 %v1005_v24, %v506_v27  ;;  %v1089_v29 = vpop.f32.mrb[2].mxu0 }
 0x162   : > { %v518_v30 = vadd.f32 %v1089_v29, %v1005_v24  ;;  %v509_v31 = vpop.f32.mrb[3].mxu0  ;;  %v571_v33 = vmax.f32 %v515_v26, 0.0 }
 0x163   : > { %v510_v32 = vadd.f32 %v1005_v24, %v509_v31  ;;  %v569_v35 = vmax.f32 %v507_v28, 0.0 }
 0x164   : > { %v572_v34 = vmax.f32 %v518_v30, 0.0 }
 0x165   : > { %v570_v36 = vmax.f32 %v510_v32, 0.0 }
 0x166   : > { %v602_v37 = vpack.c.bf16 %v572_v34, %v571_v33 }
 0x167   : > { %v1092_v38 = vpop.f32.mrb[4].mxu0  ;;  %v601_v39 = vpack.c.bf16 %v570_v36, %v569_v35 }
 0x168   : > { %v531_v40 = vadd.f32 %v1092_v38, %v1005_v24  ;;  %v522_v41 = vpop.f32.mrb[5].mxu0 }
 0x169   : > { %v523_v42 = vadd.f32 %v1005_v24, %v522_v41  ;;  %v1093_v43 = vpop.f32.mrb[6].mxu0  ;;  %1118 = vmatprep.mubr.bf16.mxu1 %v601_v39 }
 0x16a   : > { %v534_v44 = vadd.f32 %v1093_v43, %v1005_v24  ;;  %v525_v45 = vpop.f32.mrb[7].mxu0  ;;  %1119 = vmatmul.mubr.bf16.vlgmr.msra.gmra.mrb[0].mxu1 %v602_v37  ;;  %v575_v47 = vmax.f32 %v531_v40, 0.0 }
 0x16b   : > { %v526_v46 = vadd.f32 %v1005_v24, %v525_v45  ;;  %v573_v49 = vmax.f32 %v523_v42, 0.0 }
 0x16c   : > { %v576_v48 = vmax.f32 %v534_v44, 0.0 }
 0x16d   : > { %v574_v50 = vmax.f32 %v526_v46, 0.0 }
 0x16e   : > { %v604_v51 = vpack.c.bf16 %v576_v48, %v575_v47 }
 0x16f   : > { %v603_v52 = vpack.c.bf16 %v574_v50, %v573_v49  ;;  %v1096_v53 = vpop.f32.mrb[8].mxu0 }
 0x170   : > { %v547_v54 = vadd.f32 %v1096_v53, %v1005_v24  ;;  %v538_v55 = vpop.f32.mrb[9].mxu0 }
 0x171   : > { %v539_v56 = vadd.f32 %v1005_v24, %v538_v55  ;;  %v1097_v57 = vpop.f32.mrb[10].mxu0  ;;  %1122 = vmatprep.mubr.bf16.mxu1 %v603_v52 }
 0x172   : > { %v550_v58 = vadd.f32 %v1097_v57, %v1005_v24  ;;  %v541_v59 = vpop.f32.mrb[11].mxu0  ;;  %1123 = vmatmul.mubr.bf16.gmra.mrb[4].mxu1 %v604_v51  ;;  %v579_v61 = vmax.f32 %v547_v54, 0.0 }
 0x173   : > { %v542_v60 = vadd.f32 %v1005_v24, %v541_v59  ;;  %v577_v63 = vmax.f32 %v539_v56, 0.0 }
 0x174   : > { %v580_v62 = vmax.f32 %v550_v58, 0.0 }
 0x175   : > { %v578_v0 = vmax.f32 %v542_v60, 0.0 }
 0x176   : > { %v606_v1 = vpack.c.bf16 %v580_v62, %v579_v61 }
 0x177   : > { %v605_v2 = vpack.c.bf16 %v578_v0, %v577_v63  ;;  %v1100_v3 = vpop.f32.mrb[12].mxu0 }
 0x178   : > { %v563_v4 = vadd.f32 %v1100_v3, %v1005_v24  ;;  %v554_v5 = vpop.f32.mrb[13].mxu0 }
 0x179   : > { %v555_v6 = vadd.f32 %v1005_v24, %v554_v5  ;;  %v1101_v7 = vpop.f32.mrb[14].mxu0  ;;  %1126 = vmatprep.mubr.bf16.mxu1 %v605_v2 }
 0x17a   : > { %v566_v8 = vadd.f32 %v1101_v7, %v1005_v24  ;;  %v557_v9 = vpop.f32.mrb[15].mxu0  ;;  %1127 = vmatmul.mubr.bf16.gmra.mrb[8].mxu1 %v606_v1  ;;  %v583_v11 = vmax.f32 %v563_v4, 0.0 }
 0x17b   : > { %v558_v10 = vadd.f32 %v1005_v24, %v557_v9  ;;  %v581_v13 = vmax.f32 %v555_v6, 0.0 }
 0x17c   : > { %v584_v12 = vmax.f32 %v566_v8, 0.0 }
 0x17d   : > { %v582_v14 = vmax.f32 %v558_v10, 0.0 }
 0x17e   : > { %v608_v15 = vpack.c.bf16 %v584_v12, %v583_v11 }
 0x17f   : > { %v607_v16 = vpack.c.bf16 %v582_v14, %v581_v13 }
 0x181   : > { %1130 = vmatprep.mubr.bf16.mxu1 %v607_v16 }
 0x182   : > { %1131 = vmatmul.mubr.bf16.gmra.mrb[12].mxu1 %v608_v15 }
 0x23d   : > { %v1120_v18 = vpop.f32.mrb[0].mxu1 }
 0x23e   : > { %v830_v19 = vadd.f32 %v1120_v18, %v1030_v17  ;;  %v707_v20 = vpop.f32.mrb[1].mxu1 }
 0x23f   : > { %v828_v21 = vadd.f32 %v1030_v17, %v707_v20  ;;  %v1121_v22 = vpop.f32.mrb[2].mxu1 }
 0x240   : > { %846 = vst [vmem:[%s1683_s9 + $0x10] sm:$0xff] %v830_v19  ;;  %v831_v23 = vadd.f32 %v1121_v22, %v1030_v17  ;;  %v710_v24 = vpop.f32.mrb[3].mxu1 }
 0x241   : > { %844 = vst [vmem:[%s1683_s9] sm:$0xff] %v828_v21  ;;  %v829_v25 = vadd.f32 %v1030_v17, %v710_v24 }
 0x242   : > { %847 = vst [vmem:[%s1683_s9 + $0x18] sm:$0xff] %v831_v23 }
 0x243   : > { %845 = vst [vmem:[%s1683_s9 + $0x8] sm:$0xff] %v829_v25 }
 0x245   : > { %v1124_v26 = vpop.f32.mrb[4].mxu1 }
 0x246   : > { %v834_v27 = vadd.f32 %v1124_v26, %v1030_v17  ;;  %v723_v28 = vpop.f32.mrb[5].mxu1 }
 0x247   : > { %v832_v29 = vadd.f32 %v1030_v17, %v723_v28  ;;  %v1125_v30 = vpop.f32.mrb[6].mxu1 }
 0x248   : > { %850 = vst [vmem:[%s1683_s9 + $0x30] sm:$0xff] %v834_v27  ;;  %v835_v31 = vadd.f32 %v1125_v30, %v1030_v17  ;;  %v726_v32 = vpop.f32.mrb[7].mxu1 }
 0x249   : > { %848 = vst [vmem:[%s1683_s9 + $0x20] sm:$0xff] %v832_v29  ;;  %v833_v33 = vadd.f32 %v1030_v17, %v726_v32 }
 0x24a   : > { %851 = vst [vmem:[%s1683_s9 + $0x38] sm:$0xff] %v835_v31 }
 0x24b   : > { %849 = vst [vmem:[%s1683_s9 + $0x28] sm:$0xff] %v833_v33 }
 0x24d   : > { %v1128_v34 = vpop.f32.mrb[8].mxu1 }
 0x24e   : > { %v838_v35 = vadd.f32 %v1128_v34, %v1030_v17  ;;  %v739_v36 = vpop.f32.mrb[9].mxu1 }
 0x24f   : > { %v836_v37 = vadd.f32 %v1030_v17, %v739_v36  ;;  %v1129_v38 = vpop.f32.mrb[10].mxu1 }
 0x250   : > { %854 = vst [vmem:[%s1683_s9 + $0x50] sm:$0xff] %v838_v35  ;;  %v839_v39 = vadd.f32 %v1129_v38, %v1030_v17  ;;  %v742_v40 = vpop.f32.mrb[11].mxu1 }
 0x251   : > { %852 = vst [vmem:[%s1683_s9 + $0x40] sm:$0xff] %v836_v37  ;;  %v837_v41 = vadd.f32 %v1030_v17, %v742_v40 }
 0x252   : > { %855 = vst [vmem:[%s1683_s9 + $0x58] sm:$0xff] %v839_v39 }
 0x253   : > { %853 = vst [vmem:[%s1683_s9 + $0x48] sm:$0xff] %v837_v41 }
 0x255   : > { %v1132_v42 = vpop.f32.mrb[12].mxu1 }
 0x256   : > { %v842_v43 = vadd.f32 %v1132_v42, %v1030_v17  ;;  %v755_v44 = vpop.f32.mrb[13].mxu1 }
 0x257   : > { %v840_v45 = vadd.f32 %v1030_v17, %v755_v44  ;;  %v1133_v46 = vpop.f32.mrb[14].mxu1 }
 0x258   : > { %858 = vst [vmem:[%s1683_s9 + $0x70] sm:$0xff] %v842_v43  ;;  %v843_v47 = vadd.f32 %v1133_v46, %v1030_v17  ;;  %v758_v48 = vpop.f32.mrb[15].mxu1 }
 0x259   : > { %856 = vst [vmem:[%s1683_s9 + $0x60] sm:$0xff] %v840_v45  ;;  %v841_v49 = vadd.f32 %v1030_v17, %v758_v48 }
 0x25a   : > { %859 = vst [vmem:[%s1683_s9 + $0x78] sm:$0xff] %v843_v47 }
 0x25b   : > { %857 = vst [vmem:[%s1683_s9 + $0x68] sm:$0xff] %v841_v49 }
 0x25c   : > { %1344 = shalt.err (!%p1341_p11)
}
 0x25d   : > { %s1345_s28 = scalar_lea.hbm %s1703_s14, 2048  ;;  %s1349_s6 = scalar_lea.hbm %s1762_s5, 4096 }
 0x25e   : > { %p1346_p0 = scmp.ne.s32.totalorder %s1703_s14, %s1345_s28  ;;  %p1350_p6 = scmp.lt.u32.totalorder %s1703_s14, %s1762_s5 }
 0x25f   : > { %p1351_p7 = scmp.lt.u32.totalorder %s1349_s6, %s1345_s28  ;;  %p1353_p8 = scmp.lt.u32.totalorder %s1345_s28, %s1703_s14 }
 0x260   : > { %p1347_p4 = pnand %p1346_p0, %p1779_p12 }
 0x261   : > { %p1352_p2 = por %p1351_p7, %p1350_p6 }
 0x262   : > { %p1348_p13 = pneg %p1347_p4 }
 0x263   : > { %p1354_p1 = por %p1353_p8, %p1352_p2 }
 0x265   : > { %p1355_p10 = pnand %p1354_p1, %p1348_p13 }
 0x267   : > { %1358 = shalt.err (!%p1355_p10)
}
 0x268   : > { %s1425_s16 = smov 128   ;;  %s1426_s7 = smov 8  }
 0x269   : > { %1144 = dma.vmem_to_hbm [thread:$0]  (%p1779_p12), %s1705_s12, 2048, %s1703_s14, %s861_s21, %s1425_s16, %s1425_s16, %s1426_s7  }
 0x26a PF: > { %s889_s27 = sand.u32 1, %s1397_s18   ;;  %p1780_p3 = scmp.ne.s32.totalorder %s1771_s29, 0 }
 0x26b   : > { %p1781_p5 = scmp.ge.s32.totalorder %s1417_s23, 2  ;;  %s890_s15 = scalar_lea.sflag [#allocation5], %s889_s27 }
 0x26d   : > { %p1158_p9 = pnand %p1781_p5, %p1780_p3 }
 0x26f   : > { %1392 = dma.done.wait (!%p1158_p9), %s890_s15, 2048  }
 0x270   : > { %1394 = vsyncadd (!%p1158_p9), %s890_s15, 4294965248  ;;  %s22_s23 = sadd.s32 1, %s1417_s23   ;;  %s1782_s18 = smov %s1401_s19 }
 0x271   : > { %p19_p11 = scmp.ge.s32.totalorder %s22_s23, 4   ;;  %s1783_s19 = smov %s1405_s20 }
 0x272   : > { %s1784_s20 = smov %s1605_s17  ;;  %s1785_s21 = smov %s1413_s22 }
 0x273   : > { %s1786_s22 = smov %s1788_s8  ;;  %21 = sbr.rel (!%p19_p11) target bundleno = 7 (0x7), region = 106 }
 0x27a   :  { %895 = vsyncpa [#allocation4], 1 }
 0x27b   :  { %897 = vsyncpa [#allocation4 + $0x1], 1 }
 0x27c   :  { %898 = vsyncpa [#allocation7], 1 }
 0x27d   :  { %899 = vsyncpa [#allocation5], 1 }
 0x27e   :  { %901 = vsyncpa [#allocation5 + $0x1], 1 }

</bundles_post_ra>
